<compile_context>
chip_gen: v7x
topology: tpu7x:2x2x1
jax: 0.10.0
libtpu: 0.0.40
codegen_flags: <defaults>
</compile_context>

<pallas_src>
import jax
import jax.numpy as jnp
from jax import lax
from jax.experimental import pallas as pl
from jax.experimental.pallas import tpu as pltpu


def _round_up(x, m):
    return ((x + m - 1) // m) * m


# --------------------------------------------------------------------------- #
# Kernel
# --------------------------------------------------------------------------- #
def _linear_symmetric_kernel(x_ref, w_ref, o_ref, acc_ref):
    j = pl.program_id(1)   # output-column block
    k = pl.program_id(2)   # reduction (feature) block

    @pl.when(k == 0)
    def _init():
        acc_ref[...] = jnp.zeros_like(acc_ref)

    x = x_ref[...]          # (tm, tn)
    w = w_ref[...]          # (tn, tn) == W[min(k, j), max(k, j)] block

    @pl.when(k <= j)
    def _on_or_above_diag():
        # Above the diagonal A[k, j] == W[k, j]; diagonal blocks were
        # pre-symmetrized in the wrapper, so they are plain matmuls too.
        acc_ref[...] += jnp.dot(x, w, preferred_element_type=jnp.float32)

    @pl.when(k > j)
    def _below_diag():
        # Below the diagonal A[k, j] == W[j, k].T.  We fetched W[j, k]; contract
        # x's feature axis with w's second axis (transposed-rhs MXU feed) — no
        # materialized symmetric matrix, no explicit transpose in the kernel.
        acc_ref[...] += lax.dot_general(
            x, w, (((1,), (1,)), ((), ())),
            preferred_element_type=jnp.float32)

    @pl.when(k == pl.num_programs(2) - 1)
    def _finalize():
        o_ref[...] = acc_ref[...].astype(o_ref.dtype)


# --------------------------------------------------------------------------- #
# Tile / VMEM planning
# --------------------------------------------------------------------------- #
def _vmem_budget_and_phys():
    try:
        phys = int(pltpu.get_tpu_info().vmem_capacity_bytes)
    except Exception:
        phys = 64 * 1024 * 1024   # conservative fallback: v7x per-TensorCore VMEM
    budget = min(int(phys * 0.45), 48 * 1024 * 1024)
    return budget, phys


def _tile_vmem_bytes(tm, tn, itemsize):
    # Double-buffered x, w, out tiles + one resident f32 accumulator.
    return (2 * tm * tn + 2 * tn * tn + 2 * tm * tn) * itemsize + tm * tn * 4


def _select_tiles(b_pad, n_pad, itemsize, sublane_min, budget):
    # tn prefers multiples of 256 (v6e/v7x MXU is 2x256^2); 128 is a fallback.
    tn_opts = [t for t in (1024, 512, 256, 128) if n_pad % t == 0]
    tm_opts = [t for t in (1024, 512, 256, 128, 64, 32, 16, 8)
               if t >= sublane_min and b_pad % t == 0]
    if not tn_opts:
        raise ValueError(f"padded feature dim {n_pad} has no 128-multiple tile")
    if not tm_opts:
        raise ValueError(f"padded batch dim {b_pad} has no legal tile "
                         f"(sublane minimum {sublane_min})")

    def largest_tm(tn):
        for tm in tm_opts:   # descending: grow tm first (weight re-reads ~ B/tm)
            if _tile_vmem_bytes(tm, tn, itemsize) <= budget:
                return tm
        return None

    choice = None
    for tn in tn_opts:
        tm = largest_tm(tn)
        if tm is not None:
            choice = (tm, tn)
            break
    if choice is None:
        raise ValueError("VMEM budget too small for any (tm, tn) tile candidate")
    tm, tn = choice

    # v7x has 2 TensorCores sharing the 'parallel' grid axes: if the batch fits
    # in a single block, make sure the output-column axis has >= 2 blocks.
    if b_pad // tm == 1 and n_pad // tn < 2:
        for tn2 in tn_opts:
            if tn2 < tn and n_pad // tn2 >= 2:
                tm2 = largest_tm(tn2)
                if tm2 is not None:
                    tm, tn = tm2, tn2
                    break
    return tm, tn


# --------------------------------------------------------------------------- #
# Weight preparation (pad + pre-symmetrize diagonal blocks)
# --------------------------------------------------------------------------- #
def prepare_weight(weight, n_pad, tn):
    """Pad W to (n_pad, n_pad) and pre-symmetrize its (tn, tn) diagonal blocks.

    After this, diagonal block d already equals triu(Wd) + triu(Wd, 1).T, so the
    kernel never masks or double-matmuls on diagonal steps.  For a reused layer,
    call this once and cache the result — it is the only O(N^2) prep cost.
    """
    n = weight.shape[0]
    w = jnp.zeros((n_pad, n_pad), weight.dtype).at[:n, :n].set(weight)
    idx = jnp.arange(n_pad)
    same_block = (idx[:, None] // tn) == (idx[None, :] // tn)
    below = idx[:, None] > idx[None, :]
    # Inside a diagonal block: keep W on/above the diagonal, mirror it below.
    return jnp.where(same_block & below, w.T, w)


# --------------------------------------------------------------------------- #
# Wrapper
# --------------------------------------------------------------------------- #
def linear_symmetric(x, weight, *, tile_m=None, tile_n=None):
    """x: (B, N), weight: (N, N)  ->  x @ (triu(W) + triu(W, 1).T)."""
    B, N = x.shape
    assert weight.shape == (N, N), "weight must be (n_features, n_features)"
    weight = weight.astype(x.dtype)

    itemsize = jnp.dtype(x.dtype).itemsize
    # f32 -> 8, bf16 -> 16, int8/fp8 -> 32 sublane minimum.
    sublane_min = {4: 8, 2: 16, 1: 32}.get(itemsize, 8)

    n_pad = _round_up(N, 128)          # lane-dense stores, (8,128)-legal tiles
    b_pad = _round_up(B, sublane_min)

    budget, phys = _vmem_budget_and_phys()
    if tile_m is None or tile_n is None:
        auto_tm, auto_tn = _select_tiles(b_pad, n_pad, itemsize, sublane_min, budget)
    else:
        auto_tm = auto_tn = None
    tm = tile_m if tile_m is not None else auto_tm
    tn = tile_n if tile_n is not None else auto_tn
    assert b_pad % tm == 0 and n_pad % tn == 0, "tile override must divide padded dims"

    # Pad the activation; pad + diag-symmetrize the weight.
    # TODO(synk): cache prepare_weight(weight, n_pad, tn) across calls for a
    # reused layer — it is a per-parameter, not per-input, computation.
    if (b_pad, n_pad) != (B, N):
        x_p = jnp.zeros((b_pad, n_pad), x.dtype).at[:B, :N].set(x)
    else:
        x_p = x
    w_p = prepare_weight(weight, n_pad, tn)

    grid = (b_pad // tm, n_pad // tn, n_pad // tn)
    vmem_used = _tile_vmem_bytes(tm, tn, itemsize)
    vmem_limit = int(min(phys * 0.75, max(vmem_used * 1.5, 32 * 1024 * 1024)))

    out = pl.pallas_call(
        _linear_symmetric_kernel,
        out_shape=jax.ShapeDtypeStruct((b_pad, n_pad), x.dtype),
        grid_spec=pltpu.PrefetchScalarGridSpec(
            num_scalar_prefetch=0,
            grid=grid,
            in_specs=[
                # x tile: (batch block, reduction block)
                pl.BlockSpec((tm, tn), lambda i, j, k: (i, k)),
                # Weight tile: only upper-triangular blocks are ever addressed
                # (below-diagonal requests are mirrored to (j, k)).
                # TODO(synk): if profiling shows exposed weight DMA for small B,
                # add pipeline_mode=pl.Buffered(3) here (one extra tn^2 buffer).
                pl.BlockSpec(
                    (tn, tn),
                    lambda i, j, k: (jnp.minimum(k, j), jnp.maximum(k, j)),
                ),
            ],
            out_specs=pl.BlockSpec((tm, tn), lambda i, j, k: (i, j)),
            scratch_shapes=[pltpu.VMEM((tm, tn), jnp.float32)],
        ),
        compiler_params=pltpu.CompilerParams(
            dimension_semantics=("parallel", "parallel", "arbitrary"),
            vmem_limit_bytes=vmem_limit,
        ),
    )(x_p, w_p)

    return out[:B, :N]


def _reference(x, weight):
    """Pure-JAX reference matching the PyTorch forward."""
    a = jnp.triu(weight) + jnp.triu(weight, 1).T
    return x @ a


if __name__ == "__main__":
    key = jax.random.PRNGKey(0)
    k_w, k_x, k_w2, k_x2 = jax.random.split(key, 4)

    # --- small demo matching the PyTorch module (torch.rand-style init) ---
    n_features, batch = 32, 8
    weight = jax.random.uniform(k_w, (n_features, n_features), dtype=jnp.float32)
    x = jax.random.uniform(k_x, (batch, n_features), dtype=jnp.float32)

    y = jax.block_until_ready(linear_symmetric(x, weight))
    y_ref = _reference(x, weight)
    assert y.shape == (batch, n_features)
    assert jnp.allclose(y, y_ref, atol=1e-5, rtol=1e-5), "mismatch vs reference (small)"

    # --- multi-block check exercising above-/below-/on-diagonal tile paths ---
    n2, b2 = 256, 16
    weight2 = jax.random.uniform(k_w2, (n2, n2), dtype=jnp.float32)
    x2 = jax.random.uniform(k_x2, (b2, n2), dtype=jnp.float32)
    y2 = jax.block_until_ready(linear_symmetric(x2, weight2, tile_n=128))
    y2_ref = _reference(x2, weight2)
    assert jnp.allclose(y2, y2_ref, atol=1e-4, rtol=1e-4), "mismatch vs reference (tiled)"

    print("KERNEL_OK")
</pallas_src>

<mosaic_0001>
module attributes {stable_mosaic.version = 11 : i64} {
  func.func @_linear_symmetric_kernel(%arg0: i32, %arg1: i32, %arg2: i32, %arg3: memref<8x128xf32, #tpu.memory_space<vmem>>, %arg4: memref<128x128xf32, #tpu.memory_space<vmem>>, %arg5: memref<8x128xf32, #tpu.memory_space<vmem>>, %arg6: memref<8x128xf32, #tpu.memory_space<vmem>>) attributes {dimension_semantics = [#tpu.dimension_semantics<parallel>, #tpu.dimension_semantics<parallel>, #tpu.dimension_semantics<arbitrary>], iteration_bounds = array<i64: 1, 1, 1>, scalar_prefetch = 0 : i64, scratch_operands = 1 : i64, tpu.core_type = #tpu.core_type<tc>, window_params = [{transform_indices = @transform_0, window_bounds = array<i64: 8, 128>}, {transform_indices = @transform_1, window_bounds = array<i64: 128, 128>}, {transform_indices = @transform_2, window_bounds = array<i64: 8, 128>}]} {
    %c0_i32 = arith.constant 0 : i32
    %0 = arith.cmpi eq, %arg2, %c0_i32 : i32
    %1 = arith.extui %0 : i1 to i32
    %c0_i32_0 = arith.constant 0 : i32
    %2 = arith.cmpi ne, %1, %c0_i32_0 : i32
    scf.if %2 {
      %cst = arith.constant 0.000000e+00 : f32
      %14 = vector.broadcast %cst : f32 to vector<8x128xf32>
      %c0_8 = arith.constant 0 : index
      %c0_9 = arith.constant 0 : index
      %15 = vector.load %arg6[%c0_8, %c0_9] : memref<8x128xf32, #tpu.memory_space<vmem>>, vector<8x128xf32>
      tpu.vector_store %arg6[%c0_8, %c0_9], %14 {strides = array<i32>} : memref<8x128xf32, #tpu.memory_space<vmem>>, vector<8x128xf32>,
    } else {
    }
    %c0 = arith.constant 0 : index
    %c0_1 = arith.constant 0 : index
    %3 = vector.load %arg3[%c0, %c0_1] : memref<8x128xf32, #tpu.memory_space<vmem>>, vector<8x128xf32>
    %c0_2 = arith.constant 0 : index
    %c0_3 = arith.constant 0 : index
    %4 = vector.load %arg4[%c0_2, %c0_3] : memref<128x128xf32, #tpu.memory_space<vmem>>, vector<128x128xf32>
    %5 = arith.cmpi sle, %arg2, %arg1 : i32
    %6 = arith.extui %5 : i1 to i32
    %c0_i32_4 = arith.constant 0 : i32
    %7 = arith.cmpi ne, %6, %c0_i32_4 : i32
    scf.if %7 {
      %c0_8 = arith.constant 0 : index
      %c0_9 = arith.constant 0 : index
      %14 = vector.load %arg6[%c0_8, %c0_9] : memref<8x128xf32, #tpu.memory_space<vmem>>, vector<8x128xf32>
      %cst = arith.constant dense<0.000000e+00> : vector<8x128xf32>
      %15 = tpu.matmul %3, %4, %cst {dimension_numbers = #tpu.dot_dimension_numbers<[1], [0], [0], [1], [0, 0, 1, 1], [], []>} : vector<8x128xf32>, vector<128x128xf32>, vector<8x128xf32> -> vector<8x128xf32>
      %16 = arith.addf %14, %15 : vector<8x128xf32>
      %c0_10 = arith.constant 0 : index
      %c0_11 = arith.constant 0 : index
      %17 = vector.load %arg6[%c0_10, %c0_11] : memref<8x128xf32, #tpu.memory_space<vmem>>, vector<8x128xf32>
      tpu.vector_store %arg6[%c0_10, %c0_11], %16 {strides = array<i32>} : memref<8x128xf32, #tpu.memory_space<vmem>>, vector<8x128xf32>,
    } else {
    }
    %8 = arith.cmpi sgt, %arg2, %arg1 : i32
    %9 = arith.extui %8 : i1 to i32
    %c0_i32_5 = arith.constant 0 : i32
    %10 = arith.cmpi ne, %9, %c0_i32_5 : i32
    scf.if %10 {
      %c0_8 = arith.constant 0 : index
      %c0_9 = arith.constant 0 : index
      %14 = vector.load %arg6[%c0_8, %c0_9] : memref<8x128xf32, #tpu.memory_space<vmem>>, vector<8x128xf32>
      %cst = arith.constant dense<0.000000e+00> : vector<8x128xf32>
      %15 = tpu.matmul %3, %4, %cst {dimension_numbers = #tpu.dot_dimension_numbers<[1], [1], [0], [0], [0, 0, 1, 0], [], []>} : vector<8x128xf32>, vector<128x128xf32>, vector<8x128xf32> -> vector<8x128xf32>
      %16 = arith.addf %14, %15 : vector<8x128xf32>
      %c0_10 = arith.constant 0 : index
      %c0_11 = arith.constant 0 : index
      %17 = vector.load %arg6[%c0_10, %c0_11] : memref<8x128xf32, #tpu.memory_space<vmem>>, vector<8x128xf32>
      tpu.vector_store %arg6[%c0_10, %c0_11], %16 {strides = array<i32>} : memref<8x128xf32, #tpu.memory_space<vmem>>, vector<8x128xf32>,
    } else {
    }
    %c0_i32_6 = arith.constant 0 : i32
    %11 = arith.cmpi eq, %arg2, %c0_i32_6 : i32
    %12 = arith.extui %11 : i1 to i32
    %c0_i32_7 = arith.constant 0 : i32
    %13 = arith.cmpi ne, %12, %c0_i32_7 : i32
    scf.if %13 {
      %c0_8 = arith.constant 0 : index
      %c0_9 = arith.constant 0 : index
      %14 = vector.load %arg6[%c0_8, %c0_9] : memref<8x128xf32, #tpu.memory_space<vmem>>, vector<8x128xf32>
      %c0_10 = arith.constant 0 : index
      %c0_11 = arith.constant 0 : index
      %15 = vector.load %arg5[%c0_10, %c0_11] : memref<8x128xf32, #tpu.memory_space<vmem>>, vector<8x128xf32>
      tpu.vector_store %arg5[%c0_10, %c0_11], %14 {strides = array<i32>} : memref<8x128xf32, #tpu.memory_space<vmem>>, vector<8x128xf32>,
    } else {
    }
    return
  }
  func.func @transform_0(%arg0: i32, %arg1: i32, %arg2: i32) -> (i32, i32) {
    %c0_i32 = arith.constant 0 : i32
    return %arg0, %arg2 : i32, i32
  }
  func.func @transform_1(%arg0: i32, %arg1: i32, %arg2: i32) -> (i32, i32) {
    %0 = arith.minsi %arg2, %arg1 : i32
    %1 = arith.maxsi %arg2, %arg1 : i32
    %c0_i32 = arith.constant 0 : i32
    return %0, %1 : i32, i32
  }
  func.func @transform_2(%arg0: i32, %arg1: i32, %arg2: i32) -> (i32, i32) {
    %c0_i32 = arith.constant 0 : i32
    return %arg0, %arg1 : i32, i32
  }
}

</mosaic_0001>

<bundles_post_ra>
// kernel: tpu_custom_call.1
= control target key start
LH: loop header
LB: loop body
LE: loop exit
PB: predicated region body
PF: predicated region fallthrough
CT: control target
= control target key end

     0   :  { %7 = vsyncpa [#allocation4], 0  ;;  %s457_s0 = inlined_call_operand.hbm [shape: f32[8,128], index: 0, kind: input, shape index: {}]   ;;  %s458_s1 = inlined_call_operand.hbm [shape: f32[128,128], index: 1, kind: input, shape index: {}]   ;;  %s459_s2 = inlined_call_operand.hbm [shape: f32[8,128], index: 2, kind: output, shape index: {}]  }
   0x1   :  { %8 = vsyncpa [#allocation7], 0 }
   0x2   :  { %9 = vsyncpa [#allocation5], 0  ;;  %s391_s9 = smov [#allocation3]   ;;  %s392_s11 = smov [#allocation6]  }
   0x3   :  { %s16_s10 = sshll.u32 %s391_s9, 4  ;;  %s25_s12 = sshll.u32 %s392_s11, 4  ;;  %s17_s10 = int_to_ptr.vmem [resolvable:$true] %s16_s10  ;;  %s414_s12 = int_to_ptr.vmem [resolvable:$true] %s25_s12 }
   0x4   :  { %s319_s15 = scalar_lea.hbm %s457_s0, 128 }
   0x5   :  { %p320_p0 = scmp.ne.s32.totalorder %s457_s0, %s319_s15  ;;  %p323_p1 = scmp.lt.u32.totalorder %s319_s15, %s457_s0 }
   0x7   :  { %p325_p2 = pnand %p323_p1, %p320_p0 }
   0x9   :  { %328 = shalt.err (!%p325_p2)
}
   0xa   :  { %s329_s20 = scalar_lea.vmem %s17_s10, 128  ;;  %p334_p4 = scmp.lt.s32.totalorder %s17_s10, %s17_s10 }
   0xb   :  { %p330_p3 = scmp.ne.s32.totalorder %s17_s10, %s329_s20  ;;  %p335_p5 = scmp.lt.s32.totalorder %s329_s20, %s329_s20 }
   0xd   :  { %p336_p6 = por %p335_p5, %p334_p4 }
   0xf   :  { %p337_p7 = pnand %p336_p6, %p330_p3 }
  0x11   :  { %340 = shalt.err (!%p337_p7)
}
  0x12   :  { %19 = dma.hbm_to_vmem [thread:$0]  %s457_s0, 128, %s17_s10, [#allocation4]  }
  0x13   :  { %s341_s25 = scalar_lea.hbm %s458_s1, 2048 }
  0x14   :  { %p342_p8 = scmp.ne.s32.totalorder %s458_s1, %s341_s25  ;;  %p345_p9 = scmp.lt.u32.totalorder %s341_s25, %s458_s1 }
  0x16   :  { %p347_p10 = pnand %p345_p9, %p342_p8 }
  0x18   :  { %350 = shalt.err (!%p347_p10)
}
  0x19   :  { %s351_s30 = scalar_lea.vmem %s414_s12, 2048  ;;  %p356_p12 = scmp.lt.s32.totalorder %s414_s12, %s414_s12 }
  0x1a   :  { %p352_p11 = scmp.ne.s32.totalorder %s414_s12, %s351_s30  ;;  %p357_p13 = scmp.lt.s32.totalorder %s351_s30, %s351_s30 }
  0x1c   :  { %p358_p0 = por %p357_p13, %p356_p12 }
  0x1e   :  { %p359_p1 = pnand %p358_p0, %p352_p11 }
  0x20   :  { %362 = shalt.err (!%p359_p1)
}
  0x21   :  { %s393_s0 = smov 128   ;;  %s394_s3 = smov 8  }
  0x22   :  { %31 = dma.hbm_to_vmem [thread:$0]  %s458_s1, 2048, %s414_s12, [#allocation7], %s393_s0, %s393_s0, %s394_s3  }
  0x23   :  { %385 = dma.done.wait [#allocation4], 128  }
  0x24   :  { %386 = vsyncadd [#allocation4], 4294967168 }
  0x25   :  { %387 = dma.done.wait [#allocation7], 2048  }
  0x26   :  { %388 = vsyncadd [#allocation7], 4294965248  ;;  %v395_v0 = vmov 0.0|0.0   ;;  %vm396_vm0 = vmmov 0   ;;  %v397_v1 = vmov 0.0   ;;  %v44_v2 = vld [vmem:[#allocation6] sm:$0xff] }
  0x27   :  { %287 = vmatprep.subr.bf16.mxu0 %v395_v0  ;;  %284 = vmatprep.mubr.msk.f32.mxu0 %vm396_vm0, %v397_v1  ;;  %v45_v3 = vld [vmem:[#allocation6 + $0x8] sm:$0xff]  ;;  %v46_v4 = vld [vmem:[#allocation6 + $0x10] sm:$0xff]  ;;  %v47_v6 = vld [vmem:[#allocation6 + $0x18] sm:$0xff]  ;;  %s398_s1 = smov [#allocation8]  }
  0x28   :  { %v288_v5 = vpack.c.bf16 %v45_v3, %v44_v2  ;;  %v291_v7 = vpack.c.bf16 %v47_v6, %v46_v4  ;;  %v48_v8 = vld [vmem:[#allocation6 + $0x20] sm:$0xff]  ;;  %v49_v9 = vld [vmem:[#allocation6 + $0x28] sm:$0xff]  ;;  %v50_v11 = vld [vmem:[#allocation6 + $0x30] sm:$0xff]  ;;  %s225_s6 = sshll.u32 %s398_s1, 4  ;;  %s226_s6 = int_to_ptr.vmem [resolvable:$true] %s225_s6 }
  0x29   :  { %v294_v10 = vpack.c.bf16 %v49_v9, %v48_v8  ;;  %v51_v12 = vld [vmem:[#allocation6 + $0x38] sm:$0xff]  ;;  %v52_v14 = vld [vmem:[#allocation6 + $0x40] sm:$0xff]  ;;  %v53_v15 = vld [vmem:[#allocation6 + $0x48] sm:$0xff]  ;;  %s363_s7 = scalar_lea.vmem %s226_s6, 128  ;;  %p368_p3 = scmp.lt.s32.totalorder %s226_s6, %s226_s6 }
  0x2a   :  { %289 = vmatpush3.bf16.msra.mxu0 %v288_v5  ;;  %v297_v13 = vpack.c.bf16 %v51_v12, %v50_v11  ;;  %v300_v16 = vpack.c.bf16 %v53_v15, %v52_v14  ;;  %v54_v17 = vld [vmem:[#allocation6 + $0x50] sm:$0xff]  ;;  %v55_v18 = vld [vmem:[#allocation6 + $0x58] sm:$0xff]  ;;  %v56_v20 = vld [vmem:[#allocation6 + $0x60] sm:$0xff]  ;;  %p364_p2 = scmp.ne.s32.totalorder %s226_s6, %s363_s7  ;;  %p369_p4 = scmp.lt.s32.totalorder %s363_s7, %s363_s7 }
  0x2b   :  { %290 = vmatprep.subr.bf16.mxu0 %v395_v0  ;;  %v303_v19 = vpack.c.bf16 %v55_v18, %v54_v17  ;;  %v57_v21 = vld [vmem:[#allocation6 + $0x68] sm:$0xff]  ;;  %v58_v23 = vld [vmem:[#allocation6 + $0x70] sm:$0xff]  ;;  %v59_v24 = vld [vmem:[#allocation6 + $0x78] sm:$0xff] }
  0x2c   :  { %v306_v22 = vpack.c.bf16 %v57_v21, %v56_v20  ;;  %v309_v25 = vpack.c.bf16 %v59_v24, %v58_v23  ;;  %v43_v26 = vld [vmem:[#allocation3] sm:$0xff]  ;;  %p370_p5 = por %p369_p4, %p368_p3 }
  0x2e   :  { %292 = vmatpush3.bf16.msra.mxu0 %v291_v7  ;;  %p371_p6 = pnand %p370_p5, %p364_p2 }
  0x2f   :  { %293 = vmatprep.subr.bf16.mxu0 %v395_v0 }
  0x32   :  { %295 = vmatpush3.bf16.msra.mxu0 %v294_v10 }
  0x33   :  { %296 = vmatprep.subr.bf16.mxu0 %v395_v0 }
  0x36   :  { %298 = vmatpush3.bf16.msra.mxu0 %v297_v13 }
  0x37   :  { %299 = vmatprep.subr.bf16.mxu0 %v395_v0 }
  0x3a   :  { %301 = vmatpush3.bf16.msra.mxu0 %v300_v16 }
  0x3b   :  { %302 = vmatprep.subr.bf16.mxu0 %v395_v0 }
  0x3e   :  { %304 = vmatpush3.bf16.msra.mxu0 %v303_v19 }
  0x3f   :  { %305 = vmatprep.subr.bf16.mxu0 %v395_v0 }
  0x42   :  { %307 = vmatpush3.bf16.msra.mxu0 %v306_v22 }
  0x43   :  { %308 = vmatprep.subr.bf16.mxu0 %v395_v0 }
  0x46   :  { %310 = vmatpush3.bf16.msra.mxu0 %v309_v25 }
  0x49   :  { %285 = vmatmul.mubr.f32.vlgmr.msra.gmra.mrb[0].mxu0 %v43_v26 }
 0x11c   :  { %v131_v27 = vpop.f32.mrb[0].mxu0 }
 0x11d   :  { %218 = vst [vmem:[#allocation8] sm:$0xff] %v131_v27  ;;  %v286_v28 = vpop.f32.mrb[1].mxu0 }
 0x11e   :  { %374 = shalt.err (!%p371_p6)
}
 0x11f   :  { %s375_s10 = scalar_lea.hbm %s459_s2, 128 }
 0x120   :  { %p376_p7 = scmp.ne.s32.totalorder %s459_s2, %s375_s10  ;;  %p379_p8 = scmp.lt.u32.totalorder %s375_s10, %s459_s2 }
 0x122   :  { %p381_p9 = pnand %p379_p8, %p376_p7 }
 0x124   :  { %384 = shalt.err (!%p381_p9)
}
 0x125   :  { %228 = dma.vmem_to_hbm [thread:$0]  %s226_s6, 128, %s459_s2, [#allocation5]  }
 0x126   :  { %389 = dma.done.wait [#allocation5], 128  }
 0x127   :  { %390 = vsyncadd [#allocation5], 4294967168 }
 0x128   :  { %232 = vsyncpa [#allocation4], 1 }
 0x129   :  { %233 = vsyncpa [#allocation7], 1 }
 0x12a   :  { %234 = vsyncpa [#allocation5], 1 }

</bundles_post_ra>
